<compile_context>
chip_gen: v5e
topology: v5e:2x2
jax: 0.10.0
libtpu: 0.0.40
codegen_flags: <defaults>
</compile_context>

<pallas_src>
import functools
import math

import jax
import jax.numpy as jnp
from jax.experimental import pallas as pl
from jax.experimental.pallas import tpu as pltpu


# ----------------------------- Pallas kernels ------------------------------

def _qkv_proj_kernel(x_ref, y_ref, wqk_ref, bqk_ref, wv_ref, bv_ref,
                     qk_ref, v_ref):
    """Fused Q/K/V projections.

    x, y:  (B*S, d_model) f32
    wqk:   (d_model, 2*dim_k) bf16   -- [wq * norm_fact | wk]
    bqk:   (1, 2*dim_k) f32          -- [bq * norm_fact | bk]
    wv:    (d_model, dim_v) bf16
    bv:    (1, dim_v) f32
    qk:    (B*S, 2*dim_k) bf16       -- single wide lane-dense output
    v:     (B*S, dim_v) bf16
    """
    xb = x_ref[...].astype(jnp.bfloat16)
    yb = y_ref[...].astype(jnp.bfloat16)
    # bf16 MXU inputs, f32 accumulation; bias add in f32 on the VPU.
    qk = jnp.dot(xb, wqk_ref[...], preferred_element_type=jnp.float32) + bqk_ref[...]
    v = jnp.dot(yb, wv_ref[...], preferred_element_type=jnp.float32) + bv_ref[...]
    qk_ref[...] = qk.astype(qk_ref.dtype)
    v_ref[...] = v.astype(v_ref.dtype)


def _attn_out_kernel(q_ref, k_ref, v_ref, wo3_ref, bo_ref, o_ref, att_scr):
    """Attention (no softmax, as in the reference) fused with the output proj.

    q, k:  (H*B, S, dk_h) bf16  -- norm_fact already folded into q
    v:     (H*B, S, dv_h) bf16
    wo3:   (H, dv_h, d_model) bf16  -- wo reshaped per head-slot (one-time prep)
    bo:    (1, d_model) f32
    o:     (H*B, (S//H)*d_model) f32  -- C-order-flat equal to (B*S, d_model)
    att_scr: (H*B*S, dv_h) f32 VMEM scratch used to regather the module's
             C-order head regroup (it mixes seq positions into features).
    """
    HB, S, _ = q_ref.shape
    H, dv_h, dm = wo3_ref.shape
    P = S // H  # rows of the flat output produced per (head, batch) pair

    # scores[n, i, j] = sum_d q[n, i, d] * k[n, j, d]   (batched over n = h*B+b)
    scores = jax.lax.dot_general(
        q_ref[...], k_ref[...], (((2,), (2,)), ((0,), (0,))),
        preferred_element_type=jnp.float32)
    # att[n, i, d] = sum_j scores[n, i, j] * v[n, j, d]
    att = jax.lax.dot_general(
        scores.astype(jnp.bfloat16), v_ref[...], (((2,), (1,)), ((0,), (0,))),
        preferred_element_type=jnp.float32)

    # Stage att into a flat (HB*S, dv_h) scratch so the rows belonging to one
    # output row can be regathered with a strided load (stride = S over the
    # head*batch axis).  att[hb] keeps the trailing (S, dv_h) tile untouched.
    for hb in range(HB):
        att_scr[hb * S:(hb + 1) * S, :] = att[hb]

    bo = bo_ref[...]
    # Output row r = hb*P + u uses att rows s = u*H + j (j = 0..H-1) of pair hb,
    # each hitting weight slot j of wo:  out[r] = sum_j att[hb, u*H+j, :] @ wo3[j].
    for u in range(P):
        acc = jnp.zeros((HB, dm), jnp.float32)
        for j in range(H):
            a = att_scr[pl.ds(u * H + j, HB, stride=S), :].astype(jnp.bfloat16)
            acc = acc + jnp.dot(a, wo3_ref[j], preferred_element_type=jnp.float32)
        o_ref[:, u * dm:(u + 1) * dm] = acc + bo


# --------------------------- parameter preparation --------------------------

def init_params(key, d_model, dim_k, dim_v):
    """Deterministic synthetic weights, stored (d_in, d_out) so kernels compute
    x @ W + b (equivalent to torch's x @ W.T + b with W := W_t.T)."""
    ks = jax.random.split(key, 8)
    s = 0.1
    return dict(
        wq=jax.random.normal(ks[0], (d_model, dim_k), jnp.float32) * s,
        bq=jax.random.normal(ks[1], (dim_k,), jnp.float32) * s,
        wk=jax.random.normal(ks[2], (d_model, dim_k), jnp.float32) * s,
        bk=jax.random.normal(ks[3], (dim_k,), jnp.float32) * s,
        wv=jax.random.normal(ks[4], (d_model, dim_v), jnp.float32) * s,
        bv=jax.random.normal(ks[5], (dim_v,), jnp.float32) * s,
        wo=jax.random.normal(ks[6], (dim_v, d_model), jnp.float32) * s,
        bo=jax.random.normal(ks[7], (d_model,), jnp.float32) * s,
    )


def prepare_params(params, d_model, dim_k, dim_v, n_heads):
    """One-time weight prep (hoisted out of the forward path per review):
    norm_fact folded into the Q projection, wq|wk concatenated so x is read
    once, bf16 MXU casts, 2-D biases, and wo pre-split per head slot."""
    nf = 1.0 / math.sqrt(d_model)  # reference scales by d_model, not d_k
    dv_h = dim_v // n_heads
    return dict(
        w_qk=jnp.concatenate([params["wq"] * nf, params["wk"]],
                             axis=1).astype(jnp.bfloat16),
        b_qk=jnp.concatenate([params["bq"] * nf, params["bk"]]
                             ).reshape(1, 2 * dim_k).astype(jnp.float32),
        w_v=params["wv"].astype(jnp.bfloat16),
        b_v=params["bv"].reshape(1, dim_v).astype(jnp.float32),
        w_o3=params["wo"].reshape(n_heads, dv_h, d_model).astype(jnp.bfloat16),
        b_o=params["bo"].reshape(1, d_model).astype(jnp.float32),
    )


# --------------------------- module-level forward ----------------------------

@functools.partial(jax.jit, static_argnames=("d_model", "dim_k", "dim_v", "n_heads"))
def multihead_attention_forward(prepped, x, y, *, d_model, dim_k, dim_v, n_heads):
    B, S, _ = x.shape
    H = n_heads
    assert dim_k % H == 0 and dim_v % H == 0
    # TODO(synk): the fused out-projection layout assumes S % H == 0 (true for
    # the shapes exercised); the general case would fall back to a separate
    # output-projection call.
    assert S % H == 0, "fused attention+out-projection assumes seq_len % n_heads == 0"
    dk_h, dv_h = dim_k // H, dim_v // H

    x2d = x.reshape(B * S, d_model)
    y2d = y.reshape(B * S, d_model)

    # 1) Fused Q/K/V projections; bf16 intermediates, one wide q|k buffer.
    qk2d, v2d = pl.pallas_call(
        _qkv_proj_kernel,
        out_shape=(
            jax.ShapeDtypeStruct((B * S, 2 * dim_k), jnp.bfloat16),
            jax.ShapeDtypeStruct((B * S, dim_v), jnp.bfloat16),
        ),
        cost_estimate=pl.CostEstimate(
            flops=2 * B * S * d_model * (2 * dim_k + dim_v),
            transcendentals=0,
            bytes_accessed=(4 * 2 * B * S * d_model
                            + 2 * B * S * (2 * dim_k + dim_v)
                            + 2 * d_model * (2 * dim_k + dim_v)),
        ),
    )(x2d, y2d, prepped["w_qk"], prepped["b_qk"], prepped["w_v"], prepped["b_v"])

    # The module's quirky C-order head split (B,S,dim) -> (H,B,S,dim//H),
    # flattened to (H*B, S, d_h).  Pure metadata plumbing under jit.
    Q = qk2d[:, :dim_k].reshape(H * B, S, dk_h)
    K = qk2d[:, dim_k:].reshape(H * B, S, dk_h)
    V = v2d.reshape(H * B, S, dv_h)

    # 2) Attention + output projection in ONE kernel (no HBM round trip for att).
    raw = pl.pallas_call(
        _attn_out_kernel,
        out_shape=jax.ShapeDtypeStruct((H * B, (S // H) * d_model), jnp.float32),
        scratch_shapes=[pltpu.VMEM((H * B * S, dv_h), jnp.float32)],
        cost_estimate=pl.CostEstimate(
            flops=(2 * H * B * S * S * (dk_h + dv_h)
                   + 2 * B * S * dim_v * d_model),
            transcendentals=0,
            bytes_accessed=(2 * H * B * S * (2 * dk_h + dv_h)
                            + 4 * B * S * d_model
                            + 2 * dim_v * d_model),
        ),
    )(Q, K, V, prepped["w_o3"], prepped["b_o"])

    # (H*B, S//H, d_model) C-order flat == (B*S, d_model): free reshape.
    return raw.reshape(B, S, d_model)


# ------------------------------- references ---------------------------------

def reference_forward_f32(params, x, y, d_model, dim_k, dim_v, n_heads):
    """Pure-JAX f32 transcription of the torch module's forward()."""
    B, S, _ = x.shape
    norm_fact = 1.0 / math.sqrt(d_model)
    q = x @ params["wq"] + params["bq"]
    k = x @ params["wk"] + params["bk"]
    v = y @ params["wv"] + params["bv"]
    Q = q.reshape(-1, B, S, dim_k // n_heads)
    K = k.reshape(-1, B, S, dim_k // n_heads)
    V = v.reshape(-1, B, S, dim_v // n_heads)
    scores = jnp.matmul(Q, jnp.transpose(K, (0, 1, 3, 2))) * norm_fact
    out = jnp.matmul(scores, V).reshape(B, S, -1)
    return out @ params["wo"] + params["bo"]


def reference_forward_bf16(params, x, y, d_model, dim_k, dim_v, n_heads):
    """Same math, mirroring the kernels' bf16-MXU-input / f32-accum cast points."""
    B, S, _ = x.shape
    H = n_heads
    dk_h, dv_h = dim_k // H, dim_v // H
    norm_fact = 1.0 / math.sqrt(d_model)
    bf = jnp.bfloat16

    def mm(a, b):
        return jnp.dot(a.astype(bf), b.astype(bf),
                       preferred_element_type=jnp.float32)

    x2d = x.reshape(B * S, d_model)
    y2d = y.reshape(B * S, d_model)
    q = mm(x2d, params["wq"] * norm_fact) + params["bq"] * norm_fact
    k = mm(x2d, params["wk"]) + params["bk"]
    v = mm(y2d, params["wv"]) + params["bv"]
    Q = q.reshape(H * B, S, dk_h).astype(bf)
    K = k.reshape(H * B, S, dk_h).astype(bf)
    V = v.reshape(H * B, S, dv_h).astype(bf)
    scores = jax.lax.dot_general(Q, K, (((2,), (2,)), ((0,), (0,))),
                                 preferred_element_type=jnp.float32)
    out = jax.lax.dot_general(scores.astype(bf), V, (((2,), (1,)), ((0,), (0,))),
                              preferred_element_type=jnp.float32)
    out2d = out.reshape(B * S, dim_v)
    o = mm(out2d, params["wo"]) + params["bo"]
    return o.reshape(B, S, d_model)


if __name__ == "__main__":
    # Small shapes consistent with the module.
    B, S = 2, 8
    d_model, dim_k, dim_v, n_heads = 32, 32, 32, 4

    key = jax.random.PRNGKey(0)
    kx, ky, kp = jax.random.split(key, 3)
    x = jax.random.normal(kx, (B, S, d_model), jnp.float32)
    y = jax.random.normal(ky, (B, S, d_model), jnp.float32)
    params = init_params(kp, d_model, dim_k, dim_v)

    # One-time parameter preparation, outside the forward path (perf review).
    prepped = prepare_params(params, d_model, dim_k, dim_v, n_heads)

    out = multihead_attention_forward(prepped, x, y, d_model=d_model,
                                      dim_k=dim_k, dim_v=dim_v, n_heads=n_heads)
    out = jax.block_until_ready(out)
    assert out.shape == (B, S, d_model)

    # Tight check against a pure-JAX reference with the same bf16 cast points.
    ref_bf16 = reference_forward_bf16(params, x, y, d_model, dim_k, dim_v, n_heads)
    assert jnp.allclose(out, ref_bf16, atol=2e-3, rtol=2e-3), \
        "mismatch vs bf16-matched reference"

    # Semantic check against the full-f32 reference module math; tolerance is
    # loosened because the kernels feed the MXU bf16 operands.
    ref_f32 = reference_forward_f32(params, x, y, d_model, dim_k, dim_v, n_heads)
    assert jnp.allclose(out, ref_f32, atol=5e-2, rtol=5e-2), \
        "mismatch vs f32 reference"

    print("KERNEL_OK")
</pallas_src>

<mosaic_0001>
module attributes {stable_mosaic.version = 11 : i64} {
  func.func @_qkv_proj_kernel(%arg0: memref<16x32xf32, #tpu.memory_space<vmem>>, %arg1: memref<16x32xf32, #tpu.memory_space<vmem>>, %arg2: memref<32x64xbf16, #tpu.memory_space<vmem>>, %arg3: memref<1x64xf32, #tpu.memory_space<vmem>>, %arg4: memref<32x32xbf16, #tpu.memory_space<vmem>>, %arg5: memref<1x32xf32, #tpu.memory_space<vmem>>, %arg6: memref<16x64xbf16, #tpu.memory_space<vmem>>, %arg7: memref<16x32xbf16, #tpu.memory_space<vmem>>) attributes {dimension_semantics = [], scalar_prefetch = 0 : i64, scratch_operands = 0 : i64, tpu.core_type = #tpu.core_type<tc>} {
    %c0 = arith.constant 0 : index
    %c0_0 = arith.constant 0 : index
    %0 = vector.load %arg0[%c0, %c0_0] : memref<16x32xf32, #tpu.memory_space<vmem>>, vector<16x32xf32>
    %1 = arith.truncf %0 : vector<16x32xf32> to vector<16x32xbf16>
    %c0_1 = arith.constant 0 : index
    %c0_2 = arith.constant 0 : index
    %2 = vector.load %arg1[%c0_1, %c0_2] : memref<16x32xf32, #tpu.memory_space<vmem>>, vector<16x32xf32>
    %3 = arith.truncf %2 : vector<16x32xf32> to vector<16x32xbf16>
    %c0_3 = arith.constant 0 : index
    %c0_4 = arith.constant 0 : index
    %4 = vector.load %arg2[%c0_3, %c0_4] : memref<32x64xbf16, #tpu.memory_space<vmem>>, vector<32x64xbf16>
    %cst = arith.constant dense<0.000000e+00> : vector<16x64xf32>
    %5 = tpu.matmul %1, %4, %cst {dimension_numbers = #tpu.dot_dimension_numbers<[1], [0], [0], [1], [0, 0, 1, 1], [], []>} : vector<16x32xbf16>, vector<32x64xbf16>, vector<16x64xf32> -> vector<16x64xf32>
    %c0_5 = arith.constant 0 : index
    %c0_6 = arith.constant 0 : index
    %6 = vector.load %arg3[%c0_5, %c0_6] : memref<1x64xf32, #tpu.memory_space<vmem>>, vector<1x64xf32>
    %7 = vector.broadcast %6 : vector<1x64xf32> to vector<16x64xf32>
    %8 = arith.addf %5, %7 : vector<16x64xf32>
    %c0_7 = arith.constant 0 : index
    %c0_8 = arith.constant 0 : index
    %9 = vector.load %arg4[%c0_7, %c0_8] : memref<32x32xbf16, #tpu.memory_space<vmem>>, vector<32x32xbf16>
    %cst_9 = arith.constant dense<0.000000e+00> : vector<16x32xf32>
    %10 = tpu.matmul %3, %9, %cst_9 {dimension_numbers = #tpu.dot_dimension_numbers<[1], [0], [0], [1], [0, 0, 1, 1], [], []>} : vector<16x32xbf16>, vector<32x32xbf16>, vector<16x32xf32> -> vector<16x32xf32>
    %c0_10 = arith.constant 0 : index
    %c0_11 = arith.constant 0 : index
    %11 = vector.load %arg5[%c0_10, %c0_11] : memref<1x32xf32, #tpu.memory_space<vmem>>, vector<1x32xf32>
    %12 = vector.broadcast %11 : vector<1x32xf32> to vector<16x32xf32>
    %13 = arith.addf %10, %12 : vector<16x32xf32>
    %14 = arith.truncf %8 : vector<16x64xf32> to vector<16x64xbf16>
    %c0_12 = arith.constant 0 : index
    %c0_13 = arith.constant 0 : index
    %15 = vector.load %arg6[%c0_12, %c0_13] : memref<16x64xbf16, #tpu.memory_space<vmem>>, vector<16x64xbf16>
    tpu.vector_store %arg6[%c0_12, %c0_13], %14 {strides = array<i32>} : memref<16x64xbf16, #tpu.memory_space<vmem>>, vector<16x64xbf16>,
    %16 = arith.truncf %13 : vector<16x32xf32> to vector<16x32xbf16>
    %c0_14 = arith.constant 0 : index
    %c0_15 = arith.constant 0 : index
    %17 = vector.load %arg7[%c0_14, %c0_15] : memref<16x32xbf16, #tpu.memory_space<vmem>>, vector<16x32xbf16>
    tpu.vector_store %arg7[%c0_14, %c0_15], %16 {strides = array<i32>} : memref<16x32xbf16, #tpu.memory_space<vmem>>, vector<16x32xbf16>,
    return
  }
}

module attributes {stable_mosaic.version = 11 : i64} {
  func.func @_attn_out_kernel(%arg0: memref<8x8x8xbf16, #tpu.memory_space<vmem>>, %arg1: memref<8x8x8xbf16, #tpu.memory_space<vmem>>, %arg2: memref<8x8x8xbf16, #tpu.memory_space<vmem>>, %arg3: memref<4x8x32xbf16, #tpu.memory_space<vmem>>, %arg4: memref<1x32xf32, #tpu.memory_space<vmem>>, %arg5: memref<8x64xf32, #tpu.memory_space<vmem>>, %arg6: memref<64x8xf32, #tpu.memory_space<vmem>>) attributes {dimension_semantics = [], scalar_prefetch = 0 : i64, scratch_operands = 1 : i64, tpu.core_type = #tpu.core_type<tc>} {
    %c0 = arith.constant 0 : index
    %c0_0 = arith.constant 0 : index
    %c0_1 = arith.constant 0 : index
    %0 = vector.load %arg0[%c0, %c0_0, %c0_1] : memref<8x8x8xbf16, #tpu.memory_space<vmem>>, vector<8x8x8xbf16>
    %c0_2 = arith.constant 0 : index
    %c0_3 = arith.constant 0 : index
    %c0_4 = arith.constant 0 : index
    %1 = vector.load %arg1[%c0_2, %c0_3, %c0_4] : memref<8x8x8xbf16, #tpu.memory_space<vmem>>, vector<8x8x8xbf16>
    %cst = arith.constant dense<0.000000e+00> : vector<8x8x8xf32>
    %2 = tpu.matmul %0, %1, %cst {dimension_numbers = #tpu.dot_dimension_numbers<[2], [2], [1], [1], [0, 0, 0, 1, 1, 1], [0], [0]>} : vector<8x8x8xbf16>, vector<8x8x8xbf16>, vector<8x8x8xf32> -> vector<8x8x8xf32>
    %3 = arith.truncf %2 : vector<8x8x8xf32> to vector<8x8x8xbf16>
    %c0_5 = arith.constant 0 : index
    %c0_6 = arith.constant 0 : index
    %c0_7 = arith.constant 0 : index
    %4 = vector.load %arg2[%c0_5, %c0_6, %c0_7] : memref<8x8x8xbf16, #tpu.memory_space<vmem>>, vector<8x8x8xbf16>
    %cst_8 = arith.constant dense<0.000000e+00> : vector<8x8x8xf32>
    %5 = tpu.matmul %3, %4, %cst_8 {dimension_numbers = #tpu.dot_dimension_numbers<[2], [1], [1], [2], [0, 0, 0, 1, 1, 2], [0], [0]>} : vector<8x8x8xbf16>, vector<8x8x8xbf16>, vector<8x8x8xf32> -> vector<8x8x8xf32>
    %6 = vector.extract_strided_slice %5 {offsets = [0, 0, 0], sizes = [1, 8, 8], strides = [1, 1, 1]} : vector<8x8x8xf32> to vector<1x8x8xf32>
    %7 = vector.shape_cast %6 : vector<1x8x8xf32> to vector<8x8xf32>
    %c0_9 = arith.constant 0 : index
    %c0_10 = arith.constant 0 : index
    %8 = vector.load %arg6[%c0_9, %c0_10] : memref<64x8xf32, #tpu.memory_space<vmem>>, vector<8x8xf32>
    tpu.vector_store %arg6[%c0_9, %c0_10], %7 {strides = array<i32>} : memref<64x8xf32, #tpu.memory_space<vmem>>, vector<8x8xf32>,
    %9 = vector.extract_strided_slice %5 {offsets = [1, 0, 0], sizes = [1, 8, 8], strides = [1, 1, 1]} : vector<8x8x8xf32> to vector<1x8x8xf32>
    %10 = vector.shape_cast %9 : vector<1x8x8xf32> to vector<8x8xf32>
    %c8 = arith.constant 8 : index
    %c0_11 = arith.constant 0 : index
    %11 = vector.load %arg6[%c8, %c0_11] : memref<64x8xf32, #tpu.memory_space<vmem>>, vector<8x8xf32>
    tpu.vector_store %arg6[%c8, %c0_11], %10 {strides = array<i32>} : memref<64x8xf32, #tpu.memory_space<vmem>>, vector<8x8xf32>,
    %12 = vector.extract_strided_slice %5 {offsets = [2, 0, 0], sizes = [1, 8, 8], strides = [1, 1, 1]} : vector<8x8x8xf32> to vector<1x8x8xf32>
    %13 = vector.shape_cast %12 : vector<1x8x8xf32> to vector<8x8xf32>
    %c16 = arith.constant 16 : index
    %c0_12 = arith.constant 0 : index
    %14 = vector.load %arg6[%c16, %c0_12] : memref<64x8xf32, #tpu.memory_space<vmem>>, vector<8x8xf32>
    tpu.vector_store %arg6[%c16, %c0_12], %13 {strides = array<i32>} : memref<64x8xf32, #tpu.memory_space<vmem>>, vector<8x8xf32>,
    %15 = vector.extract_strided_slice %5 {offsets = [3, 0, 0], sizes = [1, 8, 8], strides = [1, 1, 1]} : vector<8x8x8xf32> to vector<1x8x8xf32>
    %16 = vector.shape_cast %15 : vector<1x8x8xf32> to vector<8x8xf32>
    %c24 = arith.constant 24 : index
    %c0_13 = arith.constant 0 : index
    %17 = vector.load %arg6[%c24, %c0_13] : memref<64x8xf32, #tpu.memory_space<vmem>>, vector<8x8xf32>
    tpu.vector_store %arg6[%c24, %c0_13], %16 {strides = array<i32>} : memref<64x8xf32, #tpu.memory_space<vmem>>, vector<8x8xf32>,
    %18 = vector.extract_strided_slice %5 {offsets = [4, 0, 0], sizes = [1, 8, 8], strides = [1, 1, 1]} : vector<8x8x8xf32> to vector<1x8x8xf32>
    %19 = vector.shape_cast %18 : vector<1x8x8xf32> to vector<8x8xf32>
    %c32 = arith.constant 32 : index
    %c0_14 = arith.constant 0 : index
    %20 = vector.load %arg6[%c32, %c0_14] : memref<64x8xf32, #tpu.memory_space<vmem>>, vector<8x8xf32>
    tpu.vector_store %arg6[%c32, %c0_14], %19 {strides = array<i32>} : memref<64x8xf32, #tpu.memory_space<vmem>>, vector<8x8xf32>,
    %21 = vector.extract_strided_slice %5 {offsets = [5, 0, 0], sizes = [1, 8, 8], strides = [1, 1, 1]} : vector<8x8x8xf32> to vector<1x8x8xf32>
    %22 = vector.shape_cast %21 : vector<1x8x8xf32> to vector<8x8xf32>
    %c40 = arith.constant 40 : index
    %c0_15 = arith.constant 0 : index
    %23 = vector.load %arg6[%c40, %c0_15] : memref<64x8xf32, #tpu.memory_space<vmem>>, vector<8x8xf32>
    tpu.vector_store %arg6[%c40, %c0_15], %22 {strides = array<i32>} : memref<64x8xf32, #tpu.memory_space<vmem>>, vector<8x8xf32>,
    %24 = vector.extract_strided_slice %5 {offsets = [6, 0, 0], sizes = [1, 8, 8], strides = [1, 1, 1]} : vector<8x8x8xf32> to vector<1x8x8xf32>
    %25 = vector.shape_cast %24 : vector<1x8x8xf32> to vector<8x8xf32>
    %c48 = arith.constant 48 : index
    %c0_16 = arith.constant 0 : index
    %26 = vector.load %arg6[%c48, %c0_16] : memref<64x8xf32, #tpu.memory_space<vmem>>, vector<8x8xf32>
    tpu.vector_store %arg6[%c48, %c0_16], %25 {strides = array<i32>} : memref<64x8xf32, #tpu.memory_space<vmem>>, vector<8x8xf32>,
    %27 = vector.extract_strided_slice %5 {offsets = [7, 0, 0], sizes = [1, 8, 8], strides = [1, 1, 1]} : vector<8x8x8xf32> to vector<1x8x8xf32>
    %28 = vector.shape_cast %27 : vector<1x8x8xf32> to vector<8x8xf32>
    %c56 = arith.constant 56 : index
    %c0_17 = arith.constant 0 : index
    %29 = vector.load %arg6[%c56, %c0_17] : memref<64x8xf32, #tpu.memory_space<vmem>>, vector<8x8xf32>
    tpu.vector_store %arg6[%c56, %c0_17], %28 {strides = array<i32>} : memref<64x8xf32, #tpu.memory_space<vmem>>, vector<8x8xf32>,
    %c0_18 = arith.constant 0 : index
    %c0_19 = arith.constant 0 : index
    %30 = vector.load %arg4[%c0_18, %c0_19] : memref<1x32xf32, #tpu.memory_space<vmem>>, vector<1x32xf32>
    %cst_20 = arith.constant 0.000000e+00 : f32
    %31 = vector.broadcast %cst_20 : f32 to vector<8x32xf32>
    %c0_21 = arith.constant 0 : index
    %c0_22 = arith.constant 0 : index
    %32 = tpu.strided_load %arg6[%c0_21, %c0_22] {strides = array<i32: 8, 1>} : memref<64x8xf32, #tpu.memory_space<vmem>>, vector<8x8xf32>
    %33 = arith.truncf %32 : vector<8x8xf32> to vector<8x8xbf16>
    %c0_23 = arith.constant 0 : index
    %c0_24 = arith.constant 0 : index
    %c0_25 = arith.constant 0 : index
    %34 = vector.load %arg3[%c0_23, %c0_24, %c0_25] : memref<4x8x32xbf16, #tpu.memory_space<vmem>>, vector<1x8x32xbf16>
    %35 = vector.shape_cast %34 : vector<1x8x32xbf16> to vector<8x32xbf16>
    %cst_26 = arith.constant dense<0.000000e+00> : vector<8x32xf32>
    %36 = tpu.matmul %33, %35, %cst_26 {dimension_numbers = #tpu.dot_dimension_numbers<[1], [0], [0], [1], [0, 0, 1, 1], [], []>} : vector<8x8xbf16>, vector<8x32xbf16>, vector<8x32xf32> -> vector<8x32xf32>
    %37 = arith.addf %31, %36 : vector<8x32xf32>
    %c1 = arith.constant 1 : index
    %c0_27 = arith.constant 0 : index
    %38 = tpu.strided_load %arg6[%c1, %c0_27] {strides = array<i32: 8, 1>} : memref<64x8xf32, #tpu.memory_space<vmem>>, vector<8x8xf32>
    %39 = arith.truncf %38 : vector<8x8xf32> to vector<8x8xbf16>
    %c1_28 = arith.constant 1 : index
    %c0_29 = arith.constant 0 : index
    %c0_30 = arith.constant 0 : index
    %40 = vector.load %arg3[%c1_28, %c0_29, %c0_30] : memref<4x8x32xbf16, #tpu.memory_space<vmem>>, vector<1x8x32xbf16>
    %41 = vector.shape_cast %40 : vector<1x8x32xbf16> to vector<8x32xbf16>
    %cst_31 = arith.constant dense<0.000000e+00> : vector<8x32xf32>
    %42 = tpu.matmul %39, %41, %cst_31 {dimension_numbers = #tpu.dot_dimension_numbers<[1], [0], [0], [1], [0, 0, 1, 1], [], []>} : vector<8x8xbf16>, vector<8x32xbf16>, vector<8x32xf32> -> vector<8x32xf32>
    %43 = arith.addf %37, %42 : vector<8x32xf32>
    %c2 = arith.constant 2 : index
    %c0_32 = arith.constant 0 : index
    %44 = tpu.strided_load %arg6[%c2, %c0_32] {strides = array<i32: 8, 1>} : memref<64x8xf32, #tpu.memory_space<vmem>>, vector<8x8xf32>
    %45 = arith.truncf %44 : vector<8x8xf32> to vector<8x8xbf16>
    %c2_33 = arith.constant 2 : index
    %c0_34 = arith.constant 0 : index
    %c0_35 = arith.constant 0 : index
    %46 = vector.load %arg3[%c2_33, %c0_34, %c0_35] : memref<4x8x32xbf16, #tpu.memory_space<vmem>>, vector<1x8x32xbf16>
    %47 = vector.shape_cast %46 : vector<1x8x32xbf16> to vector<8x32xbf16>
    %cst_36 = arith.constant dense<0.000000e+00> : vector<8x32xf32>
    %48 = tpu.matmul %45, %47, %cst_36 {dimension_numbers = #tpu.dot_dimension_numbers<[1], [0], [0], [1], [0, 0, 1, 1], [], []>} : vector<8x8xbf16>, vector<8x32xbf16>, vector<8x32xf32> -> vector<8x32xf32>
    %49 = arith.addf %43, %48 : vector<8x32xf32>
    %c3 = arith.constant 3 : index
    %c0_37 = arith.constant 0 : index
    %50 = tpu.strided_load %arg6[%c3, %c0_37] {strides = array<i32: 8, 1>} : memref<64x8xf32, #tpu.memory_space<vmem>>, vector<8x8xf32>
    %51 = arith.truncf %50 : vector<8x8xf32> to vector<8x8xbf16>
    %c3_38 = arith.constant 3 : index
    %c0_39 = arith.constant 0 : index
    %c0_40 = arith.constant 0 : index
    %52 = vector.load %arg3[%c3_38, %c0_39, %c0_40] : memref<4x8x32xbf16, #tpu.memory_space<vmem>>, vector<1x8x32xbf16>
    %53 = vector.shape_cast %52 : vector<1x8x32xbf16> to vector<8x32xbf16>
    %cst_41 = arith.constant dense<0.000000e+00> : vector<8x32xf32>
    %54 = tpu.matmul %51, %53, %cst_41 {dimension_numbers = #tpu.dot_dimension_numbers<[1], [0], [0], [1], [0, 0, 1, 1], [], []>} : vector<8x8xbf16>, vector<8x32xbf16>, vector<8x32xf32> -> vector<8x32xf32>
    %55 = arith.addf %49, %54 : vector<8x32xf32>
    %56 = vector.broadcast %30 : vector<1x32xf32> to vector<8x32xf32>
    %57 = arith.addf %55, %56 : vector<8x32xf32>
    %c0_42 = arith.constant 0 : index
    %c0_43 = arith.constant 0 : index
    %58 = vector.load %arg5[%c0_42, %c0_43] : memref<8x64xf32, #tpu.memory_space<vmem>>, vector<8x32xf32>
    tpu.vector_store %arg5[%c0_42, %c0_43], %57 {strides = array<i32>} : memref<8x64xf32, #tpu.memory_space<vmem>>, vector<8x32xf32>,
    %cst_44 = arith.constant 0.000000e+00 : f32
    %59 = vector.broadcast %cst_44 : f32 to vector<8x32xf32>
    %c4 = arith.constant 4 : index
    %c0_45 = arith.constant 0 : index
    %60 = tpu.strided_load %arg6[%c4, %c0_45] {strides = array<i32: 8, 1>} : memref<64x8xf32, #tpu.memory_space<vmem>>, vector<8x8xf32>
    %61 = arith.truncf %60 : vector<8x8xf32> to vector<8x8xbf16>
    %c0_46 = arith.constant 0 : index
    %c0_47 = arith.constant 0 : index
    %c0_48 = arith.constant 0 : index
    %62 = vector.load %arg3[%c0_46, %c0_47, %c0_48] : memref<4x8x32xbf16, #tpu.memory_space<vmem>>, vector<1x8x32xbf16>
    %63 = vector.shape_cast %62 : vector<1x8x32xbf16> to vector<8x32xbf16>
    %cst_49 = arith.constant dense<0.000000e+00> : vector<8x32xf32>
    %64 = tpu.matmul %61, %63, %cst_49 {dimension_numbers = #tpu.dot_dimension_numbers<[1], [0], [0], [1], [0, 0, 1, 1], [], []>} : vector<8x8xbf16>, vector<8x32xbf16>, vector<8x32xf32> -> vector<8x32xf32>
    %65 = arith.addf %59, %64 : vector<8x32xf32>
    %c5 = arith.constant 5 : index
    %c0_50 = arith.constant 0 : index
    %66 = tpu.strided_load %arg6[%c5, %c0_50] {strides = array<i32: 8, 1>} : memref<64x8xf32, #tpu.memory_space<vmem>>, vector<8x8xf32>
    %67 = arith.truncf %66 : vector<8x8xf32> to vector<8x8xbf16>
    %c1_51 = arith.constant 1 : index
    %c0_52 = arith.constant 0 : index
    %c0_53 = arith.constant 0 : index
    %68 = vector.load %arg3[%c1_51, %c0_52, %c0_53] : memref<4x8x32xbf16, #tpu.memory_space<vmem>>, vector<1x8x32xbf16>
    %69 = vector.shape_cast %68 : vector<1x8x32xbf16> to vector<8x32xbf16>
    %cst_54 = arith.constant dense<0.000000e+00> : vector<8x32xf32>
    %70 = tpu.matmul %67, %69, %cst_54 {dimension_numbers = #tpu.dot_dimension_numbers<[1], [0], [0], [1], [0, 0, 1, 1], [], []>} : vector<8x8xbf16>, vector<8x32xbf16>, vector<8x32xf32> -> vector<8x32xf32>
    %71 = arith.addf %65, %70 : vector<8x32xf32>
    %c6 = arith.constant 6 : index
    %c0_55 = arith.constant 0 : index
    %72 = tpu.strided_load %arg6[%c6, %c0_55] {strides = array<i32: 8, 1>} : memref<64x8xf32, #tpu.memory_space<vmem>>, vector<8x8xf32>
    %73 = arith.truncf %72 : vector<8x8xf32> to vector<8x8xbf16>
    %c2_56 = arith.constant 2 : index
    %c0_57 = arith.constant 0 : index
    %c0_58 = arith.constant 0 : index
    %74 = vector.load %arg3[%c2_56, %c0_57, %c0_58] : memref<4x8x32xbf16, #tpu.memory_space<vmem>>, vector<1x8x32xbf16>
    %75 = vector.shape_cast %74 : vector<1x8x32xbf16> to vector<8x32xbf16>
    %cst_59 = arith.constant dense<0.000000e+00> : vector<8x32xf32>
    %76 = tpu.matmul %73, %75, %cst_59 {dimension_numbers = #tpu.dot_dimension_numbers<[1], [0], [0], [1], [0, 0, 1, 1], [], []>} : vector<8x8xbf16>, vector<8x32xbf16>, vector<8x32xf32> -> vector<8x32xf32>
    %77 = arith.addf %71, %76 : vector<8x32xf32>
    %c7 = arith.constant 7 : index
    %c0_60 = arith.constant 0 : index
    %78 = tpu.strided_load %arg6[%c7, %c0_60] {strides = array<i32: 8, 1>} : memref<64x8xf32, #tpu.memory_space<vmem>>, vector<8x8xf32>
    %79 = arith.truncf %78 : vector<8x8xf32> to vector<8x8xbf16>
    %c3_61 = arith.constant 3 : index
    %c0_62 = arith.constant 0 : index
    %c0_63 = arith.constant 0 : index
    %80 = vector.load %arg3[%c3_61, %c0_62, %c0_63] : memref<4x8x32xbf16, #tpu.memory_space<vmem>>, vector<1x8x32xbf16>
    %81 = vector.shape_cast %80 : vector<1x8x32xbf16> to vector<8x32xbf16>
    %cst_64 = arith.constant dense<0.000000e+00> : vector<8x32xf32>
    %82 = tpu.matmul %79, %81, %cst_64 {dimension_numbers = #tpu.dot_dimension_numbers<[1], [0], [0], [1], [0, 0, 1, 1], [], []>} : vector<8x8xbf16>, vector<8x32xbf16>, vector<8x32xf32> -> vector<8x32xf32>
    %83 = arith.addf %77, %82 : vector<8x32xf32>
    %84 = vector.broadcast %30 : vector<1x32xf32> to vector<8x32xf32>
    %85 = arith.addf %83, %84 : vector<8x32xf32>
    %c0_65 = arith.constant 0 : index
    %c32_66 = arith.constant 32 : index
    %86 = vector.load %arg5[%c0_65, %c32_66] : memref<8x64xf32, #tpu.memory_space<vmem>>, vector<8x32xf32>
    tpu.vector_store %arg5[%c0_65, %c32_66], %85 {strides = array<i32>} : memref<8x64xf32, #tpu.memory_space<vmem>>, vector<8x32xf32>,
    return
  }
}

</mosaic_0001>

<bundles_post_ra>
// kernel: multihead_attention_forward.2
= control target key start
LH: loop header
LB: loop body
LE: loop exit
PB: predicated region body
PF: predicated region fallthrough
CT: control target
= control target key end

     0   :  { %13 = vsyncpa [#allocation3], 0  ;;  %s403_s0 = inlined_call_operand.hbm [shape: f32[16,32], index: 0, kind: input, shape index: {}]   ;;  %s404_s1 = inlined_call_operand.hbm [shape: f32[16,32], index: 1, kind: input, shape index: {}]   ;;  %s405_s2 = inlined_call_operand.hbm [shape: bf16[32,64], index: 2, kind: input, shape index: {}]   ;;  %s406_s3 = inlined_call_operand.vmem [shape: f32[1,64], index: 3, kind: input, shape index: {}]   ;;  %s407_s4 = inlined_call_operand.hbm [shape: bf16[32,32], index: 4, kind: input, shape index: {}]   ;;  %s408_s5 = inlined_call_operand.vmem [shape: f32[1,32], index: 5, kind: input, shape index: {}]   ;;  %s409_s6 = inlined_call_operand.vmem [shape: bf16[16,64], index: 6, kind: output, shape index: {0}]   ;;  %s410_s7 = inlined_call_operand.vmem [shape: bf16[16,32], index: 7, kind: output, shape index: {1}]  }
   0x1   :  { %14 = vsyncpa [#allocation5], 0 }
   0x2   :  { %15 = vsyncpa [#allocation8], 0  ;;  %s33_s26 = sshll.u32 %s404_s1, 4  ;;  %s325_s27 = smov [#allocation4]   ;;  %s34_s26 = int_to_ptr.hbm [resolvable:$true] %s33_s26 }
   0x3   :  { %s35_s28 = sshll.u32 %s325_s27, 4  ;;  %s20_s8 = sshll.u32 %s403_s0, 4  ;;  %s36_s28 = int_to_ptr.vmem [resolvable:$true] %s35_s28  ;;  %s21_s8 = int_to_ptr.hbm [resolvable:$true] %s20_s8 }
   0x4   :  { %s326_s9 = smov 128   ;;  %s327_s10 = smov 8  }
   0x5   :  { %41 = dma.hbm_to_vmem [thread:$0]  %s34_s26, 256, %s36_s28, [#allocation5], %s326_s9, %s326_s9, %s327_s10  }
   0x6   :  { %s328_s11 = smov [#allocation2]   ;;  %s46_s15 = sshll.u32 %s405_s2, 4  ;;  %s47_s15 = int_to_ptr.hbm [resolvable:$true] %s46_s15 }
   0x7   :  { %s22_s12 = sshll.u32 %s328_s11, 4  ;;  %s329_s1 = smov [#allocation6]   ;;  %s23_s12 = int_to_ptr.vmem [resolvable:$true] %s22_s12 }
   0x8   :  { %28 = dma.hbm_to_vmem [thread:$0]  %s21_s8, 256, %s23_s12, [#allocation3], %s326_s9, %s326_s9, %s327_s10  }
   0x9   :  { %s48_s16 = sshll.u32 %s329_s1, 4  ;;  %s61_s0 = sshll.u32 %s407_s4, 4  ;;  %s49_s16 = int_to_ptr.vmem [resolvable:$true] %s48_s16  ;;  %s62_s0 = int_to_ptr.hbm [resolvable:$true] %s61_s0 }
   0xa   :  { %s330_s19 = smov 64   ;;  %s331_s20 = smov 4  }
   0xb   :  { %54 = dma.hbm_to_vmem [thread:$0]  %s47_s15, 256, %s49_s16, [#allocation5], %s330_s19, %s330_s19, %s331_s20  }
   0xc   :  { %s332_s21 = smov [#allocation7]  }
   0xd   :  { %s63_s22 = sshll.u32 %s332_s21, 4  ;;  %s64_s22 = int_to_ptr.vmem [resolvable:$true] %s63_s22 }
   0xe   :  { %69 = dma.hbm_to_vmem [thread:$0]  %s62_s0, 256, %s64_s22, [#allocation8], %s330_s19, %s330_s19, %s331_s20  }
   0xf   :  { %319 = dma.done.wait [#allocation3], 256  }
  0x10   :  { %320 = vsyncadd [#allocation3], 4294967040 }
  0x11   :  { %321 = dma.done.wait [#allocation5], 512  }
  0x12   :  { %322 = vsyncadd [#allocation5], 4294966784 }
  0x13   :  { %323 = dma.done.wait [#allocation8], 256  }
  0x14   :  { %324 = vsyncadd [#allocation8], 4294967040  ;;  %v210_v0 = vld [vmem:[#allocation6 + $0x8] sm:$0xff]  ;;  %v212_v1 = vld [vmem:[#allocation7 + $0x8] sm:$0xff]  ;;  %vm115_vm0 = vcmask 261120   ;;  %vm172_vm1 = vcmask 519168  }
  0x15   :  { %v209_v2 = vld [vmem:[#allocation6] sm:$0xff]  ;;  %v211_v3 = vld [vmem:[#allocation7] sm:$0xff]  ;;  %v90_v5 = vld [vmem:[#allocation2 + $0x8] sm:$0xff]  ;;  %125 = vmatpush.bf16.msra.mxu0 %v210_v0  ;;  %162 = vmatpush.bf16.msra.mxu1 %v212_v1  ;;  %vm177_vm2 = vcmask 257024  }
  0x16   :  { %v89_v4 = vld [vmem:[#allocation2] sm:$0xff]  ;;  %v92_v6 = vld [vmem:[#allocation4] sm:$0xff]  ;;  %v93_v7 = vld [vmem:[#allocation4 + $0x8] sm:$0xff] }
  0x17   :  { %v91_v8 = vpack.c.bf16 %v90_v5, %v89_v4  ;;  %v94_v9 = vpack.c.bf16 %v93_v7, %v92_v6  ;;  %v221_v10 = vld [vmem:[%s406_s3] ss:$0 sm:$0xff] }
  0x18   :  { %v222_v11 = vld [vmem:[%s408_s5] ss:$0 sm:$0xff] }
  0x19   :  { %126 = vmatpush.bf16.msra.mxu0 %v209_v2  ;;  %163 = vmatpush.bf16.msra.mxu1 %v211_v3 }
  0x1c   :  { %199 = vmatmul.msk.bf16.vlgmr.msra.gmra.mxu0 %vm115_vm0, %v91_v8  ;;  %208 = vmatmul.msk.bf16.vlgmr.msra.gmra.mxu1 %vm115_vm0, %v94_v9 }
  0x99   :  { %v128_v12 = vpop.f32.mrf.mxu0  ;;  %v165_v13 = vpop.f32.mrf.mxu1 }
  0x9a   :  { %v129_v14 = vadd.f32 %v221_v10, %v128_v12  ;;  %v166_v15 = vadd.f32 %v222_v11, %v165_v13 }
  0x9c   :  { %v170_v16 = vpack.c.bf16 %v129_v14, %v129_v14  ;;  %v175_v17 = vpack.c.bf16 %v166_v15, %v166_v15 }
  0x9e   :  { %173 = vst.msk [vmem:[%s409_s6] sm:$0xf] %vm172_vm1, %v170_v16 }
  0x9f   :  { %178 = vst.msk [vmem:[%s410_s7] sm:$0xf] %vm177_vm2, %v175_v17 }
  0xa1   :  { %v130_v18 = vpop.f32.mrf.mxu0  ;;  %v167_v19 = vpop.f32.mrf.mxu1 }
  0xa2   :  { %v131_v20 = vadd.f32 %v221_v10, %v130_v18  ;;  %v168_v21 = vadd.f32 %v222_v11, %v167_v19 }
  0xa4   :  { %v171_v22 = vpack.c.bf16 %v131_v20, %v131_v20  ;;  %v176_v23 = vpack.c.bf16 %v168_v21, %v168_v21 }
  0xa6   :  { %174 = vst.msk [vmem:[%s409_s6 + $0x4] sm:$0xf] %vm172_vm1, %v171_v22 }
  0xa7   :  { %179 = vst.msk [vmem:[%s410_s7 + $0x4] sm:$0xf] %vm177_vm2, %v176_v23 }
  0xa8   :  { %188 = vsyncpa [#allocation3], 1 }
  0xa9   :  { %189 = vsyncpa [#allocation5], 1 }
  0xaa   :  { %190 = vsyncpa [#allocation8], 1 }

// kernel: multihead_attention_forward.3
= control target key start
LH: loop header
LB: loop body
LE: loop exit
PB: predicated region body
PF: predicated region fallthrough
CT: control target
= control target key end

     0   :  { %vm37_vm0 = vcmask 64512   ;;  %vm209_vm1 = vcmask 1043456   ;;  %vm476_vm2 = vcmask 261120   ;;  %vm585_vm3 = vcmask 523520   ;;  %s815_s1 = inlined_call_operand.vmem [shape: bf16[8,8,8], index: 1, kind: input, shape index: {}]   ;;  %s816_s0 = inlined_call_operand.vmem [shape: bf16[8,8,8], index: 0, kind: input, shape index: {}]   ;;  %s817_s2 = inlined_call_operand.vmem [shape: bf16[8,8,8], index: 2, kind: input, shape index: {}]   ;;  %s818_s3 = inlined_call_operand.vmem [shape: bf16[4,8,32], index: 3, kind: input, shape index: {}]   ;;  %s819_s4 = inlined_call_operand.vmem [shape: f32[1,32], index: 4, kind: input, shape index: {}]   ;;  %s820_s5 = inlined_call_operand.vmem [shape: f32[8,64], index: 5, kind: output, shape index: {}]  }
   0x1   :  { %v31_v0 = vld [vmem:[%s815_s1 + $0x8] sm:$0xf]  ;;  %v32_v1 = vld [vmem:[%s815_s1 + $0xc] sm:$0xf]  ;;  %v29_v2 = vld [vmem:[%s815_s1] sm:$0xf] }
   0x2   :  { %v80_v3 = vsel %vm37_vm0, %v31_v0, 0  ;;  %v99_v4 = vsel %vm37_vm0, %v32_v1, 0  ;;  %v42_v5 = vsel %vm37_vm0, %v29_v2, 0  ;;  %v30_v6 = vld [vmem:[%s815_s1 + $0x4] sm:$0xf] }
   0x3   :  { %89 = vmatpush.bf16.xpose.msra.mxu2 %v80_v3  ;;  %108 = vmatpush.bf16.xpose.msra.mxu3 %v99_v4  ;;  %v61_v7 = vsel %vm37_vm0, %v30_v6, 0  ;;  %v35_v8 = vld [vmem:[%s815_s1 + $0x18] sm:$0xf]  ;;  %v36_v9 = vld [vmem:[%s815_s1 + $0x1c] sm:$0xf] }
   0x4   :  { %51 = vmatpush.bf16.xpose.msra.mxu0 %v42_v5  ;;  %70 = vmatpush.bf16.xpose.msra.mxu1 %v61_v7  ;;  %v156_v10 = vsel %vm37_vm0, %v35_v8, 0  ;;  %v175_v11 = vsel %vm37_vm0, %v36_v9, 0  ;;  %v33_v12 = vld [vmem:[%s815_s1 + $0x10] sm:$0xf]  ;;  %v23_v13 = vld [vmem:[%s816_s0 + $0x8] sm:$0xf] }
   0x5   :  { %v118_v14 = vsel %vm37_vm0, %v33_v12, 0  ;;  %v34_v15 = vld [vmem:[%s815_s1 + $0x14] sm:$0xf]  ;;  %v24_v16 = vld [vmem:[%s816_s0 + $0xc] sm:$0xf] }
   0x6   :  { %v21_v17 = vld [vmem:[%s816_s0] sm:$0xf]  ;;  %v137_v18 = vsel %vm37_vm0, %v34_v15, 0  ;;  %v22_v19 = vld [vmem:[%s816_s0 + $0x4] sm:$0xf] }
   0x7   :  { %v200_v20 = vld [vmem:[%s817_s2 + $0x8] sm:$0xf]  ;;  %v201_v21 = vld [vmem:[%s817_s2 + $0xc] sm:$0xf]  ;;  %v198_v24 = vld [vmem:[%s817_s2] sm:$0xf] }
   0x8   :  { %v249_v22 = vsel %vm209_vm1, %v200_v20, 0  ;;  %v268_v23 = vsel %vm209_vm1, %v201_v21, 0  ;;  %v199_v25 = vld [vmem:[%s817_s2 + $0x4] sm:$0xf]  ;;  %v211_v26 = vsel %vm209_vm1, %v198_v24, 0 }
   0x9   :  { %v230_v27 = vsel %vm209_vm1, %v199_v25, 0  ;;  %v27_v28 = vld [vmem:[%s816_s0 + $0x18] sm:$0xf]  ;;  %v28_v29 = vld [vmem:[%s816_s0 + $0x1c] sm:$0xf] }
   0xa   :  { %593 = vmatmul.msk.bf16.vlgmr.msra.gmra.mxu2 %vm37_vm0, %v23_v13  ;;  %594 = vmatmul.msk.bf16.vlgmr.msra.gmra.mxu3 %vm37_vm0, %v24_v16  ;;  %v25_v30 = vld [vmem:[%s816_s0 + $0x10] sm:$0xf]  ;;  %v26_v31 = vld [vmem:[%s816_s0 + $0x14] sm:$0xf]  ;;  %v204_v32 = vld [vmem:[%s817_s2 + $0x18] sm:$0xf] }
   0xb   :  { %165 = vmatpush.bf16.xpose.msrb.mxu2 %v156_v10  ;;  %184 = vmatpush.bf16.xpose.msrb.mxu3 %v175_v11  ;;  %v205_v33 = vld [vmem:[%s817_s2 + $0x1c] sm:$0xf]  ;;  %v325_v34 = vsel %vm209_vm1, %v204_v32, 0  ;;  %v202_v36 = vld [vmem:[%s817_s2 + $0x10] sm:$0xf] }
   0xc   :  { %127 = vmatpush.bf16.xpose.msrb.mxu0 %v118_v14  ;;  %146 = vmatpush.bf16.xpose.msrb.mxu1 %v137_v18  ;;  %v344_v35 = vsel %vm209_vm1, %v205_v33, 0  ;;  %v203_v37 = vld [vmem:[%s817_s2 + $0x14] sm:$0xf]  ;;  %v287_v38 = vsel %vm209_vm1, %v202_v36, 0  ;;  %v610_v0 = vld [vmem:[%s818_s3 + $0x8] sm:$0xf] }
   0xd   :  { %591 = vmatmul.msk.bf16.vlgmr.msra.gmra.mxu0 %vm37_vm0, %v21_v17  ;;  %592 = vmatmul.msk.bf16.vlgmr.msra.gmra.mxu1 %vm37_vm0, %v22_v19  ;;  %v306_v39 = vsel %vm209_vm1, %v203_v37, 0  ;;  %v612_v1 = vld [vmem:[%s818_s3 + $0xc] sm:$0xf]  ;;  %v429_v2 = vsel %vm209_vm1, %v610_v0, 0  ;;  %v607_v4 = vld [vmem:[%s818_s3 + $0x4] sm:$0xf] }
   0xe   :  { %v456_v3 = vsel %vm209_vm1, %v612_v1, 0  ;;  %v372_v5 = vld [vmem:[%s818_s3] sm:$0xf]  ;;  %v384_v6 = vsel %vm209_vm1, %v607_v4, 0  ;;  %v617_v12 = vld [vmem:[%s818_s3 + $0x8] sm:$0xf] }
   0xf   :  { %v403_v7 = vsel %vm209_vm1, %v372_v5, 0  ;;  %v619_v13 = vld [vmem:[%s818_s3 + $0xc] sm:$0xf]  ;;  %v614_v14 = vld [vmem:[%s818_s3 + $0x4] sm:$0xf]  ;;  %v538_v17 = vsel %vm209_vm1, %v617_v12, 0 }
  0x10   :  { %v564_v18 = vsel %vm209_vm1, %v619_v13, 0  ;;  %v494_v19 = vsel %vm209_vm1, %v614_v14, 0  ;;  %v483_v20 = vld [vmem:[%s818_s3] sm:$0xf] }
  0x11   :  { %v513_v21 = vsel %vm209_vm1, %v483_v20, 0 }
  0x13   :  { %258 = vmatpush.bf16.msra.mxu2 %v249_v22  ;;  %277 = vmatpush.bf16.msra.mxu3 %v268_v23 }
  0x14   :  { %220 = vmatpush.bf16.msra.mxu0 %v211_v26  ;;  %239 = vmatpush.bf16.msra.mxu1 %v230_v27 }
  0x1a   :  { %597 = vmatmul.msk.bf16.vlgmr.msrb.gmra.mxu2 %vm37_vm0, %v27_v28  ;;  %598 = vmatmul.msk.bf16.vlgmr.msrb.gmra.mxu3 %vm37_vm0, %v28_v29 }
  0x1b   :  { %334 = vmatpush.bf16.msrb.mxu2 %v325_v34  ;;  %353 = vmatpush.bf16.msrb.mxu3 %v344_v35 }
  0x1d   :  { %595 = vmatmul.msk.bf16.vlgmr.msrb.gmra.mxu0 %vm37_vm0, %v25_v30  ;;  %596 = vmatmul.msk.bf16.vlgmr.msrb.gmra.mxu1 %vm37_vm0, %v26_v31 }
  0x1e   :  { %296 = vmatpush.bf16.msrb.mxu0 %v287_v38  ;;  %315 = vmatpush.bf16.msrb.mxu1 %v306_v39 }
  0x8a   :  { %v53_v40 = vpop.f32.mrf.mxu0  ;;  %v72_v41 = vpop.f32.mrf.mxu1 }
  0x8b   :  { %v190_v42 = vpack.c.bf16 %v53_v40, %v53_v40  ;;  %v191_v43 = vpack.c.bf16 %v72_v41, %v72_v41 }
  0x8d   :  { %599 = vmatmul.msk.bf16.vlgmr.msra.gmra.mxu0 %vm37_vm0, %v190_v42  ;;  %600 = vmatmul.msk.bf16.vlgmr.msra.gmra.mxu1 %vm37_vm0, %v191_v43  ;;  %v91_v44 = vpop.f32.mrf.mxu2  ;;  %v110_v45 = vpop.f32.mrf.mxu3 }
  0x8e   :  { %v192_v46 = vpack.c.bf16 %v91_v44, %v91_v44  ;;  %v193_v47 = vpack.c.bf16 %v110_v45, %v110_v45  ;;  %393 = vmatpush.bf16.msra.mxu0 %v384_v6  ;;  %412 = vmatpush.bf16.msra.mxu1 %v403_v7  ;;  %v622_v6 = vld [vmem:[%s819_s4] ss:$0 sm:$0xff]  ;;  %s623_s4 = smov 32  }
  0x90   :  { %601 = vmatmul.msk.bf16.vlgmr.msra.gmra.mxu2 %vm37_vm0, %v192_v46  ;;  %602 = vmatmul.msk.bf16.vlgmr.msra.gmra.mxu3 %vm37_vm0, %v193_v47 }
  0x91   :  { %438 = vmatpush.bf16.msra.mxu2 %v429_v2  ;;  %465 = vmatpush.bf16.msra.mxu3 %v456_v3 }
  0x92   :  { %v55_v48 = vpop.f32.mrf.mxu0  ;;  %v74_v49 = vpop.f32.mrf.mxu1 }
  0x95   :  { %v93_v50 = vpop.f32.mrf.mxu2  ;;  %v112_v51 = vpop.f32.mrf.mxu3 }
  0x9a   :  { %v129_v52 = vpop.f32.mrf.mxu0  ;;  %v148_v53 = vpop.f32.mrf.mxu1 }
  0x9b   :  { %v194_v54 = vpack.c.bf16 %v129_v52, %v129_v52  ;;  %v195_v55 = vpack.c.bf16 %v148_v53, %v148_v53 }
  0x9d   :  { %603 = vmatmul.msk.bf16.vlgmr.msrb.gmra.mxu0 %vm37_vm0, %v194_v54  ;;  %604 = vmatmul.msk.bf16.vlgmr.msrb.gmra.mxu1 %vm37_vm0, %v195_v55  ;;  %v167_v56 = vpop.f32.mrf.mxu2  ;;  %v186_v57 = vpop.f32.mrf.mxu3 }
  0x9e   :  { %v196_v58 = vpack.c.bf16 %v167_v56, %v167_v56  ;;  %v197_v59 = vpack.c.bf16 %v186_v57, %v186_v57  ;;  %503 = vmatpush.bf16.msrb.mxu0 %v494_v19  ;;  %522 = vmatpush.bf16.msrb.mxu1 %v513_v21 }
  0xa0   :  { %605 = vmatmul.msk.bf16.vlgmr.msrb.gmra.mxu2 %vm37_vm0, %v196_v58  ;;  %606 = vmatmul.msk.bf16.vlgmr.msrb.gmra.mxu3 %vm37_vm0, %v197_v59 }
  0xa1   :  { %547 = vmatpush.bf16.msrb.mxu2 %v538_v17  ;;  %573 = vmatpush.bf16.msrb.mxu3 %v564_v18 }
  0xa2   :  { %v131_v60 = vpop.f32.mrf.mxu0  ;;  %v150_v61 = vpop.f32.mrf.mxu1 }
  0xa5   :  { %v169_v62 = vpop.f32.mrf.mxu2  ;;  %v188_v63 = vpop.f32.mrf.mxu3 }
 0x10a   :  { %v222_v8 = vpop.f32.mrf.mxu0  ;;  %v241_v9 = vpop.f32.mrf.mxu1 }
 0x10b   :  { %359 = vst.msk [vmem:[#allocation2] sm:$0xff] %vm37_vm0, %v222_v8 }
 0x10c   :  { %360 = vst.msk [vmem:[#allocation2 + $0x8] sm:$0xff] %vm37_vm0, %v241_v9 }
 0x112   :  { %v224_v10 = vpop.f32.mrf.mxu0  ;;  %v243_v11 = vpop.f32.mrf.mxu1 }
 0x113   :  { %v260_v15 = vpop.f32.mrf.mxu2  ;;  %v279_v16 = vpop.f32.mrf.mxu3 }
 0x114   :  { %361 = vst.msk [vmem:[#allocation2 + $0x10] sm:$0xff] %vm37_vm0, %v260_v15 }
 0x115   :  { %362 = vst.msk [vmem:[#allocation2 + $0x18] sm:$0xff] %vm37_vm0, %v279_v16 }
 0x11a   :  { %v298_v22 = vpop.f32.mrf.mxu0  ;;  %v317_v23 = vpop.f32.mrf.mxu1 }
 0x11b   :  { %363 = vst.msk [vmem:[#allocation2 + $0x20] sm:$0xff] %vm37_vm0, %v298_v22  ;;  %v262_v24 = vpop.f32.mrf.mxu2  ;;  %v281_v25 = vpop.f32.mrf.mxu3 }
 0x11c   :  { %364 = vst.msk [vmem:[#allocation2 + $0x28] sm:$0xff] %vm37_vm0, %v317_v23  ;;  %v374_v30 = vld [vmem:[#allocation2 + $0x1] ss:$8 sm:$0xf] }
 0x11d   :  { %v368_v31 = vld [vmem:[#allocation2] ss:$8 sm:$0xf]  ;;  %v419_v34 = vld [vmem:[#allocation2 + $0x2] ss:$8 sm:$0xf] }
 0x11e   :  { %v446_v35 = vld [vmem:[#allocation2 + $0x3] ss:$8 sm:$0xf]  ;;  %v485_v52 = vld [vmem:[#allocation2 + $0x5] ss:$8 sm:$0xf] }
 0x11f   :  { %v479_v53 = vld [vmem:[#allocation2 + $0x4] ss:$8 sm:$0xf]  ;;  %v529_v56 = vld [vmem:[#allocation2 + $0x6] ss:$8 sm:$0xf] }
 0x120   :  { %v555_v57 = vld [vmem:[#allocation2 + $0x7] ss:$8 sm:$0xf] }
 0x122   :  { %v300_v26 = vpop.f32.mrf.mxu0  ;;  %v319_v27 = vpop.f32.mrf.mxu1 }
 0x123   :  { %v336_v28 = vpop.f32.mrf.mxu2  ;;  %v355_v29 = vpop.f32.mrf.mxu3 }
 0x124   :  { %365 = vst.msk [vmem:[#allocation2 + $0x30] sm:$0xff] %vm37_vm0, %v336_v28 }
 0x125   :  { %366 = vst.msk [vmem:[#allocation2 + $0x38] sm:$0xff] %vm37_vm0, %v355_v29 }
 0x12b   :  { %v338_v32 = vpop.f32.mrf.mxu2  ;;  %v357_v33 = vpop.f32.mrf.mxu3 }
 0x12c   :  { %v375_v36 = vld [vmem:[#allocation2 + $0x1] ss:$8 sm:$0xf0]  ;;  %v369_v37 = vld [vmem:[#allocation2] ss:$8 sm:$0xf0] }
 0x12d   :  { %v376_v38 = vor.u32 %v375_v36, %v374_v30  ;;  %v370_v39 = vor.u32 %v369_v37, %v368_v31  ;;  %v420_v40 = vld [vmem:[#allocation2 + $0x2] ss:$8 sm:$0xf0]  ;;  %v447_v41 = vld [vmem:[#allocation2 + $0x3] ss:$8 sm:$0xf0] }
 0x12e   :  { %v421_v42 = vor.u32 %v420_v40, %v419_v34  ;;  %v448_v43 = vor.u32 %v447_v41, %v446_v35  ;;  %v486_v48 = vld [vmem:[#allocation2 + $0x5] ss:$8 sm:$0xf0]  ;;  %v480_v49 = vld [vmem:[#allocation2 + $0x4] ss:$8 sm:$0xf0] }
 0x12f   :  { %v377_v44 = vpack.c.bf16 %v376_v38, %v376_v38  ;;  %v371_v45 = vpack.c.bf16 %v370_v39, %v370_v39  ;;  %v530_v50 = vld [vmem:[#allocation2 + $0x6] ss:$8 sm:$0xf0]  ;;  %v556_v51 = vld [vmem:[#allocation2 + $0x7] ss:$8 sm:$0xf0]  ;;  %v487_v54 = vor.u32 %v486_v48, %v485_v52  ;;  %v481_v55 = vor.u32 %v480_v49, %v479_v53 }
 0x130   :  { %v422_v46 = vpack.c.bf16 %v421_v42, %v421_v42  ;;  %v449_v47 = vpack.c.bf16 %v448_v43, %v448_v43  ;;  %v531_v58 = vor.u32 %v530_v50, %v529_v56  ;;  %v557_v59 = vor.u32 %v556_v51, %v555_v57 }
 0x131   :  { %608 = vmatmul.msk.bf16.vlgmr.msra.gmra.mxu0 %vm37_vm0, %v377_v44  ;;  %609 = vmatmul.msk.bf16.vlgmr.msra.gmra.mxu1 %vm37_vm0, %v371_v45  ;;  %v488_v60 = vpack.c.bf16 %v487_v54, %v487_v54  ;;  %v482_v61 = vpack.c.bf16 %v481_v55, %v481_v55 }
 0x132   :  { %611 = vmatmul.msk.bf16.vlgmr.msra.gmra.mxu2 %vm37_vm0, %v422_v46  ;;  %613 = vmatmul.msk.bf16.vlgmr.msra.gmra.mxu3 %vm37_vm0, %v449_v47  ;;  %v532_v62 = vpack.c.bf16 %v531_v58, %v531_v58  ;;  %v558_v63 = vpack.c.bf16 %v557_v59, %v557_v59 }
 0x141   :  { %615 = vmatmul.msk.bf16.vlgmr.msrb.gmra.mxu0 %vm37_vm0, %v488_v60  ;;  %616 = vmatmul.msk.bf16.vlgmr.msrb.gmra.mxu1 %vm37_vm0, %v482_v61 }
 0x142   :  { %618 = vmatmul.msk.bf16.vlgmr.msrb.gmra.mxu2 %vm37_vm0, %v532_v62  ;;  %620 = vmatmul.msk.bf16.vlgmr.msrb.gmra.mxu3 %vm37_vm0, %v558_v63 }
 0x1ae   :  { %v395_v0 = vpop.f32.mrf.mxu0  ;;  %v414_v1 = vpop.f32.mrf.mxu1 }
 0x1af   :  { %v415_v2 = vadd.f32 %v414_v1, %v395_v0 }
 0x1b5   :  { %v440_v3 = vpop.f32.mrf.mxu2  ;;  %v467_v4 = vpop.f32.mrf.mxu3 }
 0x1b6   :  { %v444_v5 = vadd.f32 %v440_v3, %v415_v2  ;;  %v397_v7 = vpop.f32.mrf.mxu0  ;;  %v416_v8 = vpop.f32.mrf.mxu1 }
 0x1b8   :  { %v471_v9 = vadd.f32 %v467_v4, %v444_v5 }
 0x1ba   :  { %v475_v10 = vadd.f32 %v622_v6, %v471_v9 }
 0x1bc   :  { %477 = vst.msk [vmem:[%s820_s5] sm:$0xff] %vm476_vm2, %v475_v10 }
 0x1bd   :  { %v442_v11 = vpop.f32.mrf.mxu2  ;;  %v469_v12 = vpop.f32.mrf.mxu3 }
 0x1be   :  { %v505_v13 = vpop.f32.mrf.mxu0  ;;  %v524_v14 = vpop.f32.mrf.mxu1 }
 0x1bf   :  { %v525_v15 = vadd.f32 %v524_v14, %v505_v13 }
 0x1c5   :  { %v549_v16 = vpop.f32.mrf.mxu2  ;;  %v575_v17 = vpop.f32.mrf.mxu3 }
 0x1c6   :  { %v553_v18 = vadd.f32 %v549_v16, %v525_v15  ;;  %v507_v19 = vpop.f32.mrf.mxu0  ;;  %v526_v20 = vpop.f32.mrf.mxu1 }
 0x1c8   :  { %v579_v21 = vadd.f32 %v575_v17, %v553_v18 }
 0x1ca   :  { %v580_v22 = vadd.f32 %v622_v6, %v579_v21 }
 0x1cc   :  { %582 = vrot.lane.b32.xlu0 %v580_v22, %s623_s4 }
 0x1cd   :  { %v551_v23 = vpop.f32.mrf.mxu2  ;;  %v577_v24 = vpop.f32.mrf.mxu3 }
 0x23e   :  { %v583_v25 = vpop.permute.xlu0 %582 }
 0x23f   :  { %586 = vst.msk [vmem:[%s820_s5] sm:$0xff] %vm585_vm3, %v583_v25 }

</bundles_post_ra>
